<compile_context>
chip_gen: v6e
topology: v6e:2x2x1
jax: 0.10.0
libtpu: 0.0.40
codegen_flags: <defaults>
</compile_context>

<pallas_src>
import math
from typing import NamedTuple, Optional

import jax
import jax.numpy as jnp
from jax import lax
from jax.experimental import pallas as pl
from jax.experimental.pallas import tpu as pltpu


def _round_up(x, m):
    return (x + m - 1) // m * m


def _pick_tile(dim_pad, max_tile, unit):
    """Largest multiple of `unit` that divides dim_pad and is <= max_tile."""
    t = max(unit, (min(max_tile, dim_pad) // unit) * unit)
    while dim_pad % t:
        t -= unit
    return t


# ---------------------------------------------------------------------------
# Kernels
# ---------------------------------------------------------------------------
def _linear_kernel_single_k(x_ref, w_ref, b_ref, o_ref):
    # Single K step: o = x @ w + b in one MXU call per (i, j) tile.
    # x_ref: (tm, tk)  w_ref: (tk, tn)  b_ref: (1, tn)  o_ref: (tm, tn) f32
    x = x_ref[...]
    if x.dtype != w_ref.dtype:            # optional bf16 compute path
        x = x.astype(w_ref.dtype)
    acc = jnp.dot(x, w_ref[...], preferred_element_type=jnp.float32)
    o_ref[...] = (acc + b_ref[...].astype(jnp.float32)).astype(o_ref.dtype)


def _linear_kernel_k_grid(x_ref, w_ref, b_ref, o_ref):
    # Multi K step: the f32 output block is resident across the K axis, so
    # accumulate directly into o_ref (no scratch accumulator, no finalize copy).
    k = pl.program_id(2)

    @pl.when(k == 0)
    def _():
        # Fold the bias add into accumulator initialization.
        o_ref[...] = jnp.broadcast_to(b_ref[...].astype(o_ref.dtype), o_ref.shape)

    x = x_ref[...]
    if x.dtype != w_ref.dtype:
        x = x.astype(w_ref.dtype)
    o_ref[...] += jnp.dot(x, w_ref[...], preferred_element_type=jnp.float32)


# ---------------------------------------------------------------------------
# Parameter prep (one-time, hoisted out of the forward pass)
# ---------------------------------------------------------------------------
class LinearParams(NamedTuple):
    w_t: jax.Array   # (din_pad, dout_pad) weight, already transposed + padded
    b: jax.Array     # (1, dout_pad) float32 bias, padded
    din: int
    dout: int


def prepare_linear_params(weight, bias, *, compute_dtype: Optional[jnp.dtype] = None):
    """One-time prep: transpose to (Din, Dout), pad to 128-multiples, cast.

    weight: (Dout, Din) float32 (PyTorch layout)
    bias:   (Dout,)     float32
    compute_dtype: e.g. jnp.bfloat16 on v6e/v7x if model tolerance allows.
    """
    dout, din = weight.shape
    din_pad = _round_up(din, 128)
    dout_pad = _round_up(dout, 128)

    w_t = weight.T                                   # (Din, Dout), one-time cost
    if compute_dtype is not None:
        w_t = w_t.astype(compute_dtype)
    if (din_pad, dout_pad) != (din, dout):
        w_t = jnp.pad(w_t, ((0, din_pad - din), (0, dout_pad - dout)))

    b2 = bias.astype(jnp.float32).reshape(1, dout)
    if dout_pad != dout:
        b2 = jnp.pad(b2, ((0, 0), (0, dout_pad - dout)))

    return LinearParams(w_t=w_t, b=b2, din=din, dout=dout)


# ---------------------------------------------------------------------------
# Forward pass
# ---------------------------------------------------------------------------
def linear_forward(
    x,
    params: LinearParams,
    *,
    tm_max=512,
    tn_max=512,
    tk_max=2048,
    force_pallas=False,
    small_problem_threshold=1 << 21,
):
    """y = x @ weight.T + bias using prepared params (nn.Linear semantics)."""
    orig_shape = x.shape
    din, dout = params.din, params.dout
    assert orig_shape[-1] == din, "last dim of x must equal input_dim"
    x2 = x.reshape(-1, din)
    m = x2.shape[0]

    # Small-problem fallback: pallas_call fixed overhead + 128-padding dwarfs
    # the actual work for tiny layers; XLA's fused dot wins there.
    if not force_pallas and (m * din * dout) < small_problem_threshold:
        y = (
            jnp.dot(x2, params.w_t[:din, :dout].astype(x2.dtype),
                    preferred_element_type=jnp.float32)
            + params.b[0, :dout]
        )
        return y.astype(jnp.float32).reshape(*orig_shape[:-1], dout)

    din_pad, dout_pad = params.w_t.shape
    m_pad = _round_up(m, 8)

    # Tiles: divisors of the 128-rounded dims -> no pad-to-tile waste.
    tm = _pick_tile(m_pad, tm_max, 8)
    tn = _pick_tile(dout_pad, tn_max, 128)
    tk = _pick_tile(din_pad, tk_max, 128)

    # v7x has 2 TensorCores sharded over the "parallel" grid axes: ensure the
    # (M, N) grid has >= 2 tiles whenever the problem allows it.
    if (m_pad // tm) * (dout_pad // tn) == 1:
        if dout_pad >= 256:
            tn = _pick_tile(dout_pad, dout_pad // 2, 128)
        elif m_pad >= 16:
            tm = _pick_tile(m_pad, m_pad // 2, 8)

    if (m_pad, din_pad) != (m, din):
        # Zero-padding is exact: padded K contributes 0, padded M sliced away.
        x2 = jnp.pad(x2, ((0, m_pad - m), (0, din_pad - din)))

    m_tiles = m_pad // tm
    n_tiles = dout_pad // tn
    k_tiles = din_pad // tk

    elt_x = x2.dtype.itemsize
    elt_w = params.w_t.dtype.itemsize

    # Honest bytes: x re-streamed once per N tile, W once per M tile.
    bytes_accessed = (
        n_tiles * m_pad * din_pad * elt_x
        + m_tiles * din_pad * dout_pad * elt_w
        + m_pad * dout_pad * 4
        + dout_pad * 4
    )
    cost = pl.CostEstimate(
        flops=2 * m_pad * din_pad * dout_pad,
        transcendentals=0,
        bytes_accessed=int(bytes_accessed),
    )

    # Double-buffered input/bias/output tiles, no scratch accumulator.
    vmem_bytes = (
        2 * tm * tk * elt_x + 2 * tk * tn * elt_w + 2 * tn * 4 + 2 * tm * tn * 4
    ) + (2 << 20)
    vmem_bytes = int(min(max(vmem_bytes, 16 << 20), 64 << 20))  # v7x-safe cap

    if k_tiles == 1:
        # Fast path: no K axis, no accumulator, no pl.when.
        grid = (m_tiles, n_tiles)
        in_specs = [
            pl.BlockSpec((tm, tk), lambda i, j: (i, 0)),   # x tile
            pl.BlockSpec((tk, tn), lambda i, j: (0, j)),   # W^T tile (Din, Dout)
            pl.BlockSpec((1, tn), lambda i, j: (0, j)),    # bias tile
        ]
        out_specs = pl.BlockSpec((tm, tn), lambda i, j: (i, j))
        kernel = _linear_kernel_single_k
        dim_sem = ("parallel", "parallel")
    else:
        grid = (m_tiles, n_tiles, k_tiles)
        in_specs = [
            pl.BlockSpec((tm, tk), lambda i, j, k: (i, k)),
            pl.BlockSpec((tk, tn), lambda i, j, k: (k, j)),
            pl.BlockSpec((1, tn), lambda i, j, k: (0, j)),
        ]
        out_specs = pl.BlockSpec((tm, tn), lambda i, j, k: (i, j))
        kernel = _linear_kernel_k_grid
        dim_sem = ("parallel", "parallel", "arbitrary")

    out = pl.pallas_call(
        kernel,
        out_shape=jax.ShapeDtypeStruct((m_pad, dout_pad), jnp.float32),
        grid_spec=pltpu.PrefetchScalarGridSpec(
            num_scalar_prefetch=0,
            grid=grid,
            in_specs=in_specs,
            out_specs=out_specs,
        ),
        compiler_params=pltpu.CompilerParams(
            dimension_semantics=dim_sem,
            vmem_limit_bytes=vmem_bytes,
        ),
        cost_estimate=cost,
    )(x2, params.w_t, params.b)

    out = out[:m, :dout]
    return out.reshape(*orig_shape[:-1], dout)


def linear_regression_forward(x, weight, bias, **kwargs):
    """Convenience one-shot wrapper (prep + forward). Prefer hoisting
    prepare_linear_params() out of the step function in real use."""
    return linear_forward(x, prepare_linear_params(weight, bias), **kwargs)


def init_linear_params(key, input_dim, output_dim):
    """Deterministic PyTorch-style init: U(-1/sqrt(in), 1/sqrt(in))."""
    kw, kb = jax.random.split(key)
    bound = 1.0 / math.sqrt(input_dim)
    weight = jax.random.uniform(
        kw, (output_dim, input_dim), jnp.float32, minval=-bound, maxval=bound
    )
    bias = jax.random.uniform(
        kb, (output_dim,), jnp.float32, minval=-bound, maxval=bound
    )
    return weight, bias


if __name__ == "__main__":
    key = jax.random.PRNGKey(0)
    k_x, k_p, k_x2, k_p2 = jax.random.split(key, 4)

    # ---- Small demo shapes consistent with the module (forced Pallas path).
    batch, input_dim, output_dim = 8, 32, 16
    x = jax.random.normal(k_x, (batch, input_dim), jnp.float32)
    weight, bias = init_linear_params(k_p, input_dim, output_dim)
    params = prepare_linear_params(weight, bias)

    y = linear_forward(x, params, force_pallas=True)     # single-K kernel
    jax.block_until_ready(y)
    y_ref = jnp.dot(x, weight.T, precision=lax.Precision.HIGHEST) + bias
    assert y.shape == (batch, output_dim)
    assert jnp.allclose(y, y_ref, atol=1e-5, rtol=1e-5)

    # Same small case through the small-problem fallback path.
    y_fb = linear_forward(x, params)
    jax.block_until_ready(y_fb)
    assert jnp.allclose(y_fb, y_ref, atol=1e-5, rtol=1e-5)

    # ---- Larger case: non-128-multiple Dout, single-K fast path, >=2 N tiles.
    b2n, din2, dout2 = 48, 640, 320
    x2 = jax.random.normal(k_x2, (b2n, din2), jnp.float32)
    w2, bi2 = init_linear_params(k_p2, din2, dout2)
    params2 = prepare_linear_params(w2, bi2)

    y2 = linear_forward(x2, params2)
    jax.block_until_ready(y2)
    y2_ref = jnp.dot(x2, w2.T, precision=lax.Precision.HIGHEST) + bi2
    assert y2.shape == (b2n, dout2)
    assert jnp.allclose(y2, y2_ref, atol=2e-4, rtol=1e-4)

    # ---- Exercise the multi-K (accumulate-into-o_ref) kernel variant by
    # capping tk below Din.
    y3 = linear_forward(x2, params2, tk_max=256, force_pallas=True)
    jax.block_until_ready(y3)
    assert jnp.allclose(y3, y2_ref, atol=2e-4, rtol=1e-4)

    print("KERNEL_OK")
</pallas_src>

<mosaic_0001>
module attributes {stable_mosaic.version = 11 : i64} {
  func.func @_linear_kernel_single_k(%arg0: i32, %arg1: i32, %arg2: memref<8x128xf32, #tpu.memory_space<vmem>>, %arg3: memref<128x128xf32, #tpu.memory_space<vmem>>, %arg4: memref<1x128xf32, #tpu.memory_space<vmem>>, %arg5: memref<8x128xf32, #tpu.memory_space<vmem>>) attributes {dimension_semantics = [#tpu.dimension_semantics<parallel>, #tpu.dimension_semantics<parallel>], iteration_bounds = array<i64: 1, 1>, scalar_prefetch = 0 : i64, scratch_operands = 0 : i64, tpu.core_type = #tpu.core_type<tc>, window_params = [{transform_indices = @transform_0, window_bounds = array<i64: 8, 128>}, {transform_indices = @transform_1, window_bounds = array<i64: 128, 128>}, {transform_indices = @transform_2, window_bounds = array<i64: 1, 128>}, {transform_indices = @transform_3, window_bounds = array<i64: 8, 128>}]} {
    %c0 = arith.constant 0 : index
    %c0_0 = arith.constant 0 : index
    %0 = vector.load %arg2[%c0, %c0_0] : memref<8x128xf32, #tpu.memory_space<vmem>>, vector<8x128xf32>
    %c0_1 = arith.constant 0 : index
    %c0_2 = arith.constant 0 : index
    %1 = vector.load %arg3[%c0_1, %c0_2] : memref<128x128xf32, #tpu.memory_space<vmem>>, vector<128x128xf32>
    %cst = arith.constant dense<0.000000e+00> : vector<8x128xf32>
    %2 = tpu.matmul %0, %1, %cst {dimension_numbers = #tpu.dot_dimension_numbers<[1], [0], [0], [1], [0, 0, 1, 1], [], []>} : vector<8x128xf32>, vector<128x128xf32>, vector<8x128xf32> -> vector<8x128xf32>
    %c0_3 = arith.constant 0 : index
    %c0_4 = arith.constant 0 : index
    %3 = vector.load %arg4[%c0_3, %c0_4] : memref<1x128xf32, #tpu.memory_space<vmem>>, vector<1x128xf32>
    %4 = vector.broadcast %3 : vector<1x128xf32> to vector<8x128xf32>
    %5 = arith.addf %2, %4 : vector<8x128xf32>
    %c0_5 = arith.constant 0 : index
    %c0_6 = arith.constant 0 : index
    %6 = vector.load %arg5[%c0_5, %c0_6] : memref<8x128xf32, #tpu.memory_space<vmem>>, vector<8x128xf32>
    tpu.vector_store %arg5[%c0_5, %c0_6], %5 {strides = array<i32>} : memref<8x128xf32, #tpu.memory_space<vmem>>, vector<8x128xf32>,
    return
  }
  func.func @transform_0(%arg0: i32, %arg1: i32) -> (i32, i32) {
    %c0_i32 = arith.constant 0 : i32
    %c0_i32_0 = arith.constant 0 : i32
    return %arg0, %c0_i32 : i32, i32
  }
  func.func @transform_1(%arg0: i32, %arg1: i32) -> (i32, i32) {
    %c0_i32 = arith.constant 0 : i32
    %c0_i32_0 = arith.constant 0 : i32
    return %c0_i32, %arg1 : i32, i32
  }
  func.func @transform_2(%arg0: i32, %arg1: i32) -> (i32, i32) {
    %c0_i32 = arith.constant 0 : i32
    %c0_i32_0 = arith.constant 0 : i32
    return %c0_i32, %arg1 : i32, i32
  }
  func.func @transform_3(%arg0: i32, %arg1: i32) -> (i32, i32) {
    %c0_i32 = arith.constant 0 : i32
    return %arg0, %arg1 : i32, i32
  }
}

</mosaic_0001>

<bundles_post_ra>
// kernel: tpu_custom_call.1
= control target key start
LH: loop header
LB: loop body
LE: loop exit
PB: predicated region body
PF: predicated region fallthrough
CT: control target
= control target key end

     0   :  { %8 = vsyncpa [#allocation3], 0  ;;  %s317_s0 = inlined_call_operand.hbm [shape: f32[8,128], index: 0, kind: input, shape index: {}]   ;;  %s318_s1 = inlined_call_operand.hbm [shape: f32[128,128], index: 1, kind: input, shape index: {}]   ;;  %s319_s2 = inlined_call_operand.vmem [shape: f32[1,128], index: 2, kind: input, shape index: {}]   ;;  %s320_s3 = inlined_call_operand.hbm [shape: f32[8,128], index: 3, kind: output, shape index: {}]  }
   0x1   :  { %9 = vsyncpa [#allocation6], 0 }
   0x2   :  { %10 = vsyncpa [#allocation4], 0  ;;  %s278_s12 = smov [#allocation2]   ;;  %s279_s14 = smov [#allocation5]  }
   0x3   :  { %s17_s13 = sshll.u32 %s278_s12, 4  ;;  %s26_s15 = sshll.u32 %s279_s14, 4  ;;  %s18_s13 = int_to_ptr.vmem [resolvable:$true] %s17_s13  ;;  %s27_s15 = int_to_ptr.vmem [resolvable:$true] %s26_s15 }
   0x4   :  { %s220_s16 = scalar_lea.vmem %s18_s13, 128  ;;  %p225_p1 = scmp.lt.s32.totalorder %s18_s13, %s18_s13 }
   0x5   :  { %p221_p0 = scmp.ne.s32.totalorder %s18_s13, %s220_s16  ;;  %p226_p2 = scmp.lt.s32.totalorder %s220_s16, %s220_s16 }
   0x7   :  { %p227_p3 = por %p226_p2, %p225_p1 }
   0x9   :  { %p228_p4 = pnand %p227_p3, %p221_p0 }
   0xb   :  { %231 = shalt.err (!%p228_p4)
}
   0xc   :  { %20 = dma.hbm_to_vmem [thread:$0]  %s317_s0, 128, %s18_s13, [#allocation3]  }
   0xd   :  { %s240_s19 = scalar_lea.vmem %s27_s15, 2048  ;;  %p245_p6 = scmp.lt.s32.totalorder %s27_s15, %s27_s15 }
   0xe   :  { %p241_p5 = scmp.ne.s32.totalorder %s27_s15, %s240_s19  ;;  %p246_p7 = scmp.lt.s32.totalorder %s240_s19, %s240_s19 }
  0x10   :  { %p247_p8 = por %p246_p7, %p245_p6 }
  0x12   :  { %p248_p9 = pnand %p247_p8, %p241_p5 }
  0x14   :  { %251 = shalt.err (!%p248_p9)
}
  0x15   :  { %s280_s20 = smov 128   ;;  %s281_s21 = smov 8  }
  0x16   :  { %32 = dma.hbm_to_vmem [thread:$0]  %s318_s1, 2048, %s27_s15, [#allocation6], %s280_s20, %s280_s20, %s281_s21  }
  0x17   :  { %272 = dma.done.wait [#allocation3], 128  }
  0x18   :  { %273 = vsyncadd [#allocation3], 4294967168 }
  0x19   :  { %274 = dma.done.wait [#allocation6], 2048  }
  0x1a   :  { %275 = vsyncadd [#allocation6], 4294965248  ;;  %v282_v0 = vmov 0.0   ;;  %vm283_vm0 = vmmov 0   ;;  %v57_v1 = vld [vmem:[#allocation5 + $0x78] sm:$0xff]  ;;  %v56_v2 = vld [vmem:[#allocation5 + $0x70] sm:$0xff] }
  0x1b   :  { %170 = vmatprep.subr.mxu0 %v282_v0  ;;  %202 = vmatprep.mubr.msk.f32.mxu0 %vm283_vm0, %v282_v0  ;;  %v55_v3 = vld [vmem:[#allocation5 + $0x68] sm:$0xff]  ;;  %v54_v4 = vld [vmem:[#allocation5 + $0x60] sm:$0xff]  ;;  %v53_v5 = vld [vmem:[#allocation5 + $0x58] sm:$0xff]  ;;  %s284_s24 = smov [#allocation7]  }
  0x1c   :  { %171 = vmatpush3.msra.mxu0 %v57_v1  ;;  %v52_v6 = vld [vmem:[#allocation5 + $0x50] sm:$0xff]  ;;  %v51_v7 = vld [vmem:[#allocation5 + $0x48] sm:$0xff]  ;;  %v50_v8 = vld [vmem:[#allocation5 + $0x40] sm:$0xff]  ;;  %s142_s25 = sshll.u32 %s284_s24, 4  ;;  %s143_s25 = int_to_ptr.vmem [resolvable:$true] %s142_s25 }
  0x1d   :  { %172 = vmatprep.subr.mxu0 %v282_v0  ;;  %v49_v9 = vld [vmem:[#allocation5 + $0x38] sm:$0xff]  ;;  %v48_v10 = vld [vmem:[#allocation5 + $0x30] sm:$0xff]  ;;  %v47_v11 = vld [vmem:[#allocation5 + $0x28] sm:$0xff]  ;;  %s252_s26 = scalar_lea.vmem %s143_s25, 128  ;;  %p257_p11 = scmp.lt.s32.totalorder %s143_s25, %s143_s25 }
  0x1e   :  { %173 = vmatpush3.msra.mxu0 %v56_v2  ;;  %v46_v12 = vld [vmem:[#allocation5 + $0x20] sm:$0xff]  ;;  %v45_v13 = vld [vmem:[#allocation5 + $0x18] sm:$0xff]  ;;  %v44_v14 = vld [vmem:[#allocation5 + $0x10] sm:$0xff]  ;;  %p253_p10 = scmp.ne.s32.totalorder %s143_s25, %s252_s26  ;;  %p258_p12 = scmp.lt.s32.totalorder %s252_s26, %s252_s26 }
  0x1f   :  { %174 = vmatprep.subr.mxu0 %v282_v0  ;;  %v43_v15 = vld [vmem:[#allocation5 + $0x8] sm:$0xff]  ;;  %v42_v16 = vld [vmem:[#allocation5] sm:$0xff]  ;;  %v41_v17 = vld [vmem:[#allocation2] sm:$0xff] }
  0x20   :  { %175 = vmatpush3.msra.mxu0 %v55_v3  ;;  %v152_v18 = vld [vmem:[%s319_s2] ss:$0 sm:$0xff]  ;;  %p259_p13 = por %p258_p12, %p257_p11 }
  0x21   :  { %176 = vmatprep.subr.mxu0 %v282_v0 }
  0x22   :  { %177 = vmatpush3.msra.mxu0 %v54_v4  ;;  %p260_p0 = pnand %p259_p13, %p253_p10 }
  0x23   :  { %178 = vmatprep.subr.mxu0 %v282_v0 }
  0x24   :  { %179 = vmatpush3.msra.mxu0 %v53_v5 }
  0x25   :  { %180 = vmatprep.subr.mxu0 %v282_v0 }
  0x26   :  { %181 = vmatpush3.msra.mxu0 %v52_v6 }
  0x27   :  { %182 = vmatprep.subr.mxu0 %v282_v0 }
  0x28   :  { %183 = vmatpush3.msra.mxu0 %v51_v7 }
  0x29   :  { %184 = vmatprep.subr.mxu0 %v282_v0 }
  0x2a   :  { %185 = vmatpush3.msra.mxu0 %v50_v8 }
  0x2b   :  { %186 = vmatprep.subr.mxu0 %v282_v0 }
  0x2c   :  { %187 = vmatpush3.msra.mxu0 %v49_v9 }
  0x2d   :  { %188 = vmatprep.subr.mxu0 %v282_v0 }
  0x2e   :  { %189 = vmatpush3.msra.mxu0 %v48_v10 }
  0x2f   :  { %190 = vmatprep.subr.mxu0 %v282_v0 }
  0x30   :  { %191 = vmatpush3.msra.mxu0 %v47_v11 }
  0x31   :  { %192 = vmatprep.subr.mxu0 %v282_v0 }
  0x32   :  { %193 = vmatpush3.msra.mxu0 %v46_v12 }
  0x33   :  { %194 = vmatprep.subr.mxu0 %v282_v0 }
  0x34   :  { %195 = vmatpush3.msra.mxu0 %v45_v13 }
  0x35   :  { %196 = vmatprep.subr.mxu0 %v282_v0 }
  0x36   :  { %197 = vmatpush3.msra.mxu0 %v44_v14 }
  0x37   :  { %198 = vmatprep.subr.mxu0 %v282_v0 }
  0x38   :  { %199 = vmatpush3.msra.mxu0 %v43_v15 }
  0x39   :  { %200 = vmatprep.subr.mxu0 %v282_v0 }
  0x3a   :  { %201 = vmatpush3.msra.mxu0 %v42_v16 }
  0x3b   :  { %203 = vmatmul.mubr.f32.vlgmr.msra.gmra.mxu0 %v41_v17 }
  0xfb   :  { %v131_v19 = vpop.f32.mrf.mxu0 }
  0xfc   :  { %v132_v20 = vadd.f32 %v152_v18, %v131_v19 }
  0xfd   :  { %v204_v21 = vpop.f32.mrf.mxu0 }
  0xfe   :  { %135 = vst [vmem:[#allocation7] sm:$0xff] %v132_v20 }
  0xff   :  { %263 = shalt.err (!%p260_p0)
}
 0x100   :  { %145 = dma.vmem_to_hbm [thread:$0]  %s143_s25, 128, %s320_s3, [#allocation4]  }
 0x101   :  { %276 = dma.done.wait [#allocation4], 128  }
 0x102   :  { %277 = vsyncadd [#allocation4], 4294967168 }
 0x103   :  { %149 = vsyncpa [#allocation3], 1 }
 0x104   :  { %150 = vsyncpa [#allocation6], 1 }
 0x105   :  { %151 = vsyncpa [#allocation4], 1 }

</bundles_post_ra>
